<compile_context>
chip_gen: v7x
topology: tpu7x:2x2x1
jax: 0.10.0
libtpu: 0.0.40
codegen_flags: <defaults>
</compile_context>

<pallas_src>
import functools

import jax
import jax.numpy as jnp
from jax.experimental import pallas as pl
from jax.experimental.pallas import tpu as pltpu

LANES = 128
SUBLANES = 8
MAX_BLOCK_ROWS = 4096   # 4096 * 128 * 4B = 2 MiB per input tile
NUM_SPLITS = 2          # leading "parallel" grid axis (2 TCs on v7x)


def _round_up(x, m):
    return (x + m - 1) // m * m


def _charbonnier_kernel(x_ref, y_ref, out_ref, acc_ref, *,
                        eps, n_blocks, blocks_per_split, tail_valid):
    c = pl.program_id(0)            # split (parallel) index
    i = pl.program_id(1)            # block index within split (reduction axis)
    g = c * blocks_per_split + i    # global block index (clamped in index_map)
    last_i = pl.num_programs(1) - 1

    @pl.when(i == 0)
    def _init():
        acc_ref[...] = jnp.zeros_like(acc_ref)

    diff = x_ref[...].astype(jnp.float32) - y_ref[...].astype(jnp.float32)
    val = jnp.sqrt(diff * diff + jnp.float32(eps) * jnp.float32(eps))

    # Interior blocks: unmasked elementwise accumulate (pure VPU, hides under DMA).
    @pl.when(g < n_blocks - 1)
    def _interior():
        acc_ref[...] += val

    # Globally-last valid block: mask lane padding / out-of-bounds tail rows.
    @pl.when(g == n_blocks - 1)
    def _last_block():
        row = jax.lax.broadcasted_iota(jnp.int32, val.shape, 0)
        col = jax.lax.broadcasted_iota(jnp.int32, val.shape, 1)
        mask = (row * LANES + col) < tail_valid
        acc_ref[...] += jnp.where(mask, val, 0.0)

    # (g > n_blocks - 1: duplicated clamped block on the last split -> skipped.)

    # Per-split finalize: fold the (block_rows, 128) accumulator to one (8,128)
    # tile with vreg adds and write it to this split's output block.
    @pl.when(i == last_i)
    def _finalize():
        partial = acc_ref[...].reshape(-1, SUBLANES, LANES).sum(axis=0)
        out_ref[...] = partial.reshape(1, SUBLANES, LANES)


def charbonnier_loss(x, y, epsilon=1e-6):
    assert x.shape == y.shape
    n_valid = x.size

    xf = x.reshape(-1)
    yf = y.reshape(-1)

    # Pad only to a lane multiple (<=127 elements); tail is masked in-kernel.
    n_pad = (-n_valid) % LANES
    if n_pad:
        xf = jnp.pad(xf, (0, n_pad))
        yf = jnp.pad(yf, (0, n_pad))

    rows = xf.size // LANES
    x2d = xf.reshape(rows, LANES)
    y2d = yf.reshape(rows, LANES)

    block_rows = min(MAX_BLOCK_ROWS, _round_up(rows, SUBLANES))
    block_elems = block_rows * LANES
    n_blocks = -(-rows // block_rows)
    blocks_per_split = -(-n_blocks // NUM_SPLITS)
    # Valid element count inside the globally-last block (static, fits int32).
    tail_valid = n_valid - (n_blocks - 1) * block_elems

    def in_map(c, i):
        # Clamp so the (at most one) surplus block of the last split re-reads a
        # valid block instead of going out of bounds; its contribution is
        # skipped inside the kernel.
        return (jnp.minimum(c * blocks_per_split + i, n_blocks - 1), 0)

    kernel = functools.partial(
        _charbonnier_kernel, eps=float(epsilon), n_blocks=n_blocks,
        blocks_per_split=blocks_per_split, tail_valid=tail_valid)

    partials = pl.pallas_call(
        kernel,
        out_shape=jax.ShapeDtypeStruct((NUM_SPLITS, SUBLANES, LANES),
                                       jnp.float32),
        grid_spec=pltpu.PrefetchScalarGridSpec(
            num_scalar_prefetch=0,
            grid=(NUM_SPLITS, blocks_per_split),
            in_specs=[
                pl.BlockSpec((block_rows, LANES), in_map),
                pl.BlockSpec((block_rows, LANES), in_map),
            ],
            out_specs=pl.BlockSpec((1, SUBLANES, LANES),
                                   lambda c, i: (c, 0, 0)),
            scratch_shapes=[pltpu.VMEM((block_rows, LANES), jnp.float32)],
        ),
        compiler_params=pltpu.CompilerParams(
            dimension_semantics=("parallel", "arbitrary"),
            vmem_limit_bytes=32 * 1024 * 1024),
    )(x2d, y2d)

    return jnp.sum(partials) / jnp.float32(n_valid)


def charbonnier_loss_ref(x, y, epsilon=1e-6):
    diff = x.astype(jnp.float32) - y.astype(jnp.float32)
    return jnp.mean(jnp.sqrt(diff * diff + epsilon * epsilon))


if __name__ == "__main__":
    key = jax.random.PRNGKey(0)
    kx, ky = jax.random.split(key)
    # NCHW inputs, same convention as the PyTorch module.
    x = jax.random.normal(kx, (2, 4, 16, 16), dtype=jnp.float32)
    y = jax.random.normal(ky, (2, 4, 16, 16), dtype=jnp.float32)

    loss = charbonnier_loss(x, y)
    jax.block_until_ready(loss)

    ref = charbonnier_loss_ref(x, y)
    assert jnp.allclose(loss, ref, rtol=1e-5, atol=1e-6), (loss, ref)
    print("KERNEL_OK")
</pallas_src>

<mosaic_0001>
module attributes {stable_mosaic.version = 11 : i64} {
  func.func @_charbonnier_kernel(%arg0: i32, %arg1: i32, %arg2: memref<16x128xf32, #tpu.memory_space<vmem>>, %arg3: memref<16x128xf32, #tpu.memory_space<vmem>>, %arg4: memref<1x8x128xf32, #tpu.memory_space<vmem>>, %arg5: memref<16x128xf32, #tpu.memory_space<vmem>>) attributes {dimension_semantics = [#tpu.dimension_semantics<parallel>, #tpu.dimension_semantics<arbitrary>], iteration_bounds = array<i64: 2, 1>, scalar_prefetch = 0 : i64, scratch_operands = 1 : i64, tpu.core_type = #tpu.core_type<tc>, window_params = [{transform_indices = @transform_0, window_bounds = array<i64: 16, 128>}, {transform_indices = @transform_1, window_bounds = array<i64: 16, 128>}, {transform_indices = @transform_2, window_bounds = array<i64: 1, 8, 128>}]} {
    %c1_i32 = arith.constant 1 : i32
    %0 = arith.muli %arg0, %c1_i32 : i32
    %1 = arith.addi %0, %arg1 : i32
    %c0_i32 = arith.constant 0 : i32
    %2 = arith.cmpi eq, %arg1, %c0_i32 : i32
    %3 = arith.extui %2 : i1 to i32
    %c0_i32_0 = arith.constant 0 : i32
    %4 = arith.cmpi ne, %3, %c0_i32_0 : i32
    scf.if %4 {
      %cst_11 = arith.constant 0.000000e+00 : f32
      %22 = vector.broadcast %cst_11 : f32 to vector<16x128xf32>
      %c0_12 = arith.constant 0 : index
      %c0_13 = arith.constant 0 : index
      %23 = vector.load %arg5[%c0_12, %c0_13] : memref<16x128xf32, #tpu.memory_space<vmem>>, vector<16x128xf32>
      tpu.vector_store %arg5[%c0_12, %c0_13], %22 {strides = array<i32>} : memref<16x128xf32, #tpu.memory_space<vmem>>, vector<16x128xf32>,
    } else {
    }
    %c0 = arith.constant 0 : index
    %c0_1 = arith.constant 0 : index
    %5 = vector.load %arg2[%c0, %c0_1] : memref<16x128xf32, #tpu.memory_space<vmem>>, vector<16x128xf32>
    %c0_2 = arith.constant 0 : index
    %c0_3 = arith.constant 0 : index
    %6 = vector.load %arg3[%c0_2, %c0_3] : memref<16x128xf32, #tpu.memory_space<vmem>>, vector<16x128xf32>
    %7 = arith.subf %5, %6 : vector<16x128xf32>
    %8 = arith.mulf %7, %7 : vector<16x128xf32>
    %cst = arith.constant 9.99999997E-7 : f32
    %cst_4 = arith.constant 9.99999997E-7 : f32
    %9 = arith.mulf %cst, %cst_4 : f32
    %10 = vector.broadcast %9 : f32 to vector<16x128xf32>
    %11 = arith.addf %8, %10 : vector<16x128xf32>
    %12 = math.sqrt %11 : vector<16x128xf32>
    %c0_i32_5 = arith.constant 0 : i32
    %13 = arith.cmpi slt, %1, %c0_i32_5 : i32
    %14 = arith.extui %13 : i1 to i32
    %c0_i32_6 = arith.constant 0 : i32
    %15 = arith.cmpi ne, %14, %c0_i32_6 : i32
    scf.if %15 {
      %c0_11 = arith.constant 0 : index
      %c0_12 = arith.constant 0 : index
      %22 = vector.load %arg5[%c0_11, %c0_12] : memref<16x128xf32, #tpu.memory_space<vmem>>, vector<16x128xf32>
      %23 = arith.addf %22, %12 : vector<16x128xf32>
      %c0_13 = arith.constant 0 : index
      %c0_14 = arith.constant 0 : index
      %24 = vector.load %arg5[%c0_13, %c0_14] : memref<16x128xf32, #tpu.memory_space<vmem>>, vector<16x128xf32>
      tpu.vector_store %arg5[%c0_13, %c0_14], %23 {strides = array<i32>} : memref<16x128xf32, #tpu.memory_space<vmem>>, vector<16x128xf32>,
    } else {
    }
    %c0_i32_7 = arith.constant 0 : i32
    %16 = arith.cmpi eq, %1, %c0_i32_7 : i32
    %17 = arith.extui %16 : i1 to i32
    %c0_i32_8 = arith.constant 0 : i32
    %18 = arith.cmpi ne, %17, %c0_i32_8 : i32
    scf.if %18 {
      %22 = tpu.iota {dimensions = array<i32: 0>} : vector<16x128xi32>
      %23 = tpu.iota {dimensions = array<i32: 1>} : vector<16x128xi32>
      %c128_i32 = arith.constant 128 : i32
      %24 = vector.broadcast %c128_i32 : i32 to vector<16x128xi32>
      %25 = arith.muli %22, %24 : vector<16x128xi32>
      %26 = arith.addi %25, %23 : vector<16x128xi32>
      %c2048_i32 = arith.constant 2048 : i32
      %27 = vector.broadcast %c2048_i32 : i32 to vector<16x128xi32>
      %28 = arith.cmpi slt, %26, %27 : vector<16x128xi32>
      %c0_11 = arith.constant 0 : index
      %c0_12 = arith.constant 0 : index
      %29 = vector.load %arg5[%c0_11, %c0_12] : memref<16x128xf32, #tpu.memory_space<vmem>>, vector<16x128xf32>
      %cst_13 = arith.constant 0.000000e+00 : f32
      %30 = vector.broadcast %cst_13 : f32 to vector<16x128xf32>
      %31 = arith.select %28, %12, %30 : vector<16x128xi1>, vector<16x128xf32>
      %32 = arith.addf %29, %31 : vector<16x128xf32>
      %c0_14 = arith.constant 0 : index
      %c0_15 = arith.constant 0 : index
      %33 = vector.load %arg5[%c0_14, %c0_15] : memref<16x128xf32, #tpu.memory_space<vmem>>, vector<16x128xf32>
      tpu.vector_store %arg5[%c0_14, %c0_15], %32 {strides = array<i32>} : memref<16x128xf32, #tpu.memory_space<vmem>>, vector<16x128xf32>,
    } else {
    }
    %c0_i32_9 = arith.constant 0 : i32
    %19 = arith.cmpi eq, %arg1, %c0_i32_9 : i32
    %20 = arith.extui %19 : i1 to i32
    %c0_i32_10 = arith.constant 0 : i32
    %21 = arith.cmpi ne, %20, %c0_i32_10 : i32
    scf.if %21 {
      %c0_11 = arith.constant 0 : index
      %c0_12 = arith.constant 0 : index
      %22 = vector.load %arg5[%c0_11, %c0_12] : memref<16x128xf32, #tpu.memory_space<vmem>>, vector<16x128xf32>
      %23 = vector.shape_cast %22 : vector<16x128xf32> to vector<2x8x128xf32>
      %cst_13 = arith.constant dense<0.000000e+00> : vector<8x128xf32>
      %24 = vector.multi_reduction <add>, %23, %cst_13 [0] : vector<2x8x128xf32> to vector<8x128xf32>
      %25 = vector.shape_cast %24 : vector<8x128xf32> to vector<1x8x128xf32>
      %c0_14 = arith.constant 0 : index
      %c0_15 = arith.constant 0 : index
      %c0_16 = arith.constant 0 : index
      %26 = vector.load %arg4[%c0_14, %c0_15, %c0_16] : memref<1x8x128xf32, #tpu.memory_space<vmem>>, vector<1x8x128xf32>
      tpu.vector_store %arg4[%c0_14, %c0_15, %c0_16], %25 {strides = array<i32>} : memref<1x8x128xf32, #tpu.memory_space<vmem>>, vector<1x8x128xf32>,
    } else {
    }
    return
  }
  func.func @transform_0(%arg0: i32, %arg1: i32) -> (i32, i32) {
    %c1_i32 = arith.constant 1 : i32
    %0 = arith.muli %arg0, %c1_i32 : i32
    %1 = arith.addi %0, %arg1 : i32
    %c0_i32 = arith.constant 0 : i32
    %2 = arith.minsi %1, %c0_i32 : i32
    %c0_i32_0 = arith.constant 0 : i32
    %c0_i32_1 = arith.constant 0 : i32
    return %2, %c0_i32_0 : i32, i32
  }
  func.func @transform_1(%arg0: i32, %arg1: i32) -> (i32, i32) {
    %c1_i32 = arith.constant 1 : i32
    %0 = arith.muli %arg0, %c1_i32 : i32
    %1 = arith.addi %0, %arg1 : i32
    %c0_i32 = arith.constant 0 : i32
    %2 = arith.minsi %1, %c0_i32 : i32
    %c0_i32_0 = arith.constant 0 : i32
    %c0_i32_1 = arith.constant 0 : i32
    return %2, %c0_i32_0 : i32, i32
  }
  func.func @transform_2(%arg0: i32, %arg1: i32) -> (i32, i32, i32) {
    %c0_i32 = arith.constant 0 : i32
    %c0_i32_0 = arith.constant 0 : i32
    %c0_i32_1 = arith.constant 0 : i32
    return %arg0, %c0_i32, %c0_i32_0 : i32, i32, i32
  }
}

</mosaic_0001>

<bundles_post_ra>
// kernel: tpu_custom_call.1
= control target key start
LH: loop header
LB: loop body
LE: loop exit
PB: predicated region body
PF: predicated region fallthrough
CT: control target
= control target key end

     0   :  { %7 = vsyncpa [#allocation4], 0  ;;  %s952_s0 = inlined_call_operand.hbm [shape: f32[16,128], index: 0, kind: input, shape index: {}]   ;;  %s953_s1 = inlined_call_operand.hbm [shape: f32[16,128], index: 1, kind: input, shape index: {}]   ;;  %s954_s2 = inlined_call_operand.hbm [shape: f32[2,8,128], index: 2, kind: output, shape index: {}]  }
   0x1   :  { %9 = vsyncpa [#allocation4 + $0x1], 0 }
   0x2   :  { %10 = vsyncpa [#allocation7], 0 }
   0x3   :  { %12 = vsyncpa [#allocation7 + $0x1], 0 }
   0x4   :  { %13 = vsyncpa [#allocation5], 0 }
   0x5   :  { %15 = vsyncpa [#allocation5 + $0x1], 0  ;;  %s736_s9 = smov 0   ;;  %s738_s10 = smov 0  }
   0x6   :  { %s740_s11 = smov 0   ;;  %s742_s12 = smov 0  }
   0x7   :  { %s744_s13 = smov 0   ;;  %s746_s14 = smov 0  }
   0x8   :  { %s748_s15 = smov 0   ;;  %s750_s16 = smov 0  }
   0x9 LB: > { %s426_s17 = sadd.s32 4294967295, %s713_s16   ;;  %s427_s18 = sadd.s32 4294967294, %s713_s16   ;;  %s713_s16 = sphi %s750_s16, %s21_s16   ;;  %s709_s15 = sphi %s748_s15, %s973_s15   ;;  %s705_s14 = sphi %s746_s14, %s972_s14   ;;  %s701_s13 = sphi %s744_s13, %s942_s13   ;;  %s697_s12 = sphi %s742_s12, %s971_s12   ;;  %s693_s11 = sphi %s740_s11, %s970_s11   ;;  %s689_s10 = sphi %s738_s10, %s969_s10   ;;  %s685_s9 = sphi %s736_s9, %s968_s9  }
   0xa   : > { %s33_s19 = sadd.s32 1, %s709_s15  ;;  %p682_p1 = scmp.ne.s32.totalorder %s701_s13, 0 }
   0xb   : > { %p35_p0 = scmp.ge.s32.totalorder %s33_s19, 2  ;;  %p54_p2 = scmp.eq.s32.totalorder %s713_s16, 0 }
   0xc   : > { %p59_p3 = scmp.ne.s32.totalorder %s701_s13, %s697_s12  ;;  %p60_p5 = scmp.eq.s32.totalorder %s426_s17, 0 }
   0xd   : > { %s975_s19 = smov (%p35_p0, %s33_s19), 0  ;;  %p782_p4 = por %p682_p1, %p54_p2 }
   0xe   : > { %p786_p6 = por %p60_p5, %p59_p3  ;;  %s101_s22 = ssub.s32 %s709_s15, %s975_s19 }
   0xf   : > { %p102_p7 = scmp.eq.s32.totalorder %s101_s22, 0  ;;  %s104_s23 = sadd.s32 1, %s693_s11 }
  0x10   : > { %s958_s21 = scalar_select %p786_p6, 1, 0 }
  0x11   : > { %s794_s24 = scalar_select %p102_p7, %s693_s11, %s104_s23  }
  0x12   : > { %p114_p8 = scmp.ne.s32.totalorder %s693_s11, %s689_s10  ;;  %p115_p9 = scmp.eq.s32.totalorder %s426_s17, 1 }
  0x13   : > { %p120_p10 = scmp.ne.s32.totalorder %s689_s10, %s685_s9  ;;  %p121_p11 = scmp.eq.s32.totalorder %s427_s18, 1 }
  0x14   : > { %p800_p12 = por %p115_p9, %p114_p8  ;;  %p465_p1 = scmp.lt.s32.totalorder %s713_s16, 2 }
  0x15   : > { %p805_p0 = por %p121_p11, %p120_p10  ;;  %s715_s27 = smov [#allocation3]  }
  0x16   : > { %s959_s25 = scalar_select %p800_p12, 1, 0 }
  0x17   : > { %s960_s26 = scalar_select %p805_p0, 1, 0 }
  0x18   : > { %s155_s28 = sshll.u32 %s715_s27, 4  ;;  %p812_p2 = pnand %p465_p1, %p782_p4  ;;  %s156_s28 = int_to_ptr.vmem [resolvable:$true] %s155_s28 }
  0x19   : > { %s546_s4 = scalar_lea.hbm %s952_s0, 256 }
  0x1a   : > { %p547_p3 = scmp.ne.s32.totalorder %s952_s0, %s546_s4  ;;  %p548_p5 = pneg %p812_p2 }
  0x1b   : > { %p553_p8 = scmp.lt.u32.totalorder %s546_s4, %s546_s4  ;;  %p555_p9 = scmp.lt.u32.totalorder %s546_s4, %s952_s0 }
  0x1c   : > { %p549_p7 = pnand %p548_p5, %p547_p3 }
  0x1d   : > { %p556_p10 = por %p555_p9, %p553_p8 }
  0x1e   : > { %p550_p4 = pneg %p549_p7 }
  0x20   : > { %p557_p11 = pnand %p556_p10, %p550_p4 }
  0x22   : > { %560 = shalt.err (!%p557_p11)
}
  0x23   : > { %s561_s12 = scalar_lea.vmem %s156_s28, 256  ;;  %s568_s17 = scalar_lea.vmem %s156_s28, 512 }
  0x24   : > { %p562_p1 = scmp.ne.s32.totalorder %s156_s28, %s561_s12  ;;  %p569_p12 = scmp.lt.s32.totalorder %s156_s28, %s156_s28 }
  0x25   : > { %p570_p6 = scmp.lt.s32.totalorder %s568_s17, %s561_s12 }
  0x26   : > { %p564_p13 = pnand %p562_p1, %p548_p5 }
  0x27   : > { %p571_p3 = por %p570_p6, %p569_p12 }
  0x28   : > { %p565_p0 = pneg %p564_p13 }
  0x2a   : > { %p572_p7 = pnand %p571_p3, %p565_p0 }
  0x2c   : > { %575 = shalt.err (!%p572_p7)
}
  0x2d   : > { %s716_s18 = smov 128   ;;  %s717_s20 = smov 8  }
  0x2e   : > { %457 = dma.hbm_to_vmem [thread:$0]  (!%p812_p2), %s952_s0, 256, %s156_s28, [#allocation4], %s716_s18, %s716_s18, %s717_s20  }
  0x2f   : > { %p436_p13 = scmp.ge.s32.totalorder %s713_s16, 1  ;;  %p187_p4 = scmp.lt.s32.totalorder %s713_s16, 3 }
  0x30   : > { %s718_s30 = smov [#allocation6]   ;;  %s576_s6 = scalar_lea.hbm %s953_s1, 256 }
  0x31   : > { %p843_p8 = pnand %p436_p13, %p187_p4  ;;  %s179_s3 = sshll.u32 %s718_s30, 4  ;;  %s180_s3 = int_to_ptr.vmem [resolvable:$true] %s179_s3 }
  0x32   : > { %p577_p6 = scmp.ne.s32.totalorder %s953_s1, %s576_s6  ;;  %p583_p9 = scmp.lt.u32.totalorder %s576_s6, %s576_s6 }
  0x33   : > { %s962_s27 = scalar_select %p843_p8, 1, 0 }
  0x34   : > { %p579_p12 = pnand %p577_p6, %p548_p5  ;;  %p585_p10 = scmp.lt.u32.totalorder %s576_s6, %s953_s1 }
  0x36   : > { %p580_p0 = pneg %p579_p12  ;;  %p586_p11 = por %p585_p10, %p583_p9 }
  0x38   : > { %p587_p1 = pnand %p586_p11, %p580_p0 }
  0x3a   : > { %590 = shalt.err (!%p587_p1)
}
  0x3b   : > { %s591_s17 = scalar_lea.vmem %s180_s3, 256  ;;  %s598_s22 = scalar_lea.vmem %s180_s3, 512 }
  0x3c   : > { %p592_p3 = scmp.ne.s32.totalorder %s180_s3, %s591_s17  ;;  %p599_p4 = scmp.lt.s32.totalorder %s180_s3, %s180_s3 }
  0x3d   : > { %p600_p8 = scmp.lt.s32.totalorder %s598_s22, %s591_s17 }
  0x3e   : > { %p594_p7 = pnand %p592_p3, %p548_p5 }
  0x3f   : > { %p601_p6 = por %p600_p8, %p599_p4 }
  0x40   : > { %p595_p13 = pneg %p594_p7 }
  0x42   : > { %p602_p12 = pnand %p601_p6, %p595_p13 }
  0x44   : > { %605 = shalt.err (!%p602_p12)
}
  0x45   : > { %460 = dma.hbm_to_vmem [thread:$0]  (!%p812_p2), %s953_s1, 256, %s180_s3, [#allocation7], %s716_s18, %s716_s18, %s717_s20  }
  0x46   : > { %p963_p0 = scmp.ne.s32.totalorder %s962_s27, 0 }
  0x47   : > { %s193_s4 = sand.u32 (!%p963_p0), 1, %s701_s13   ;;  %p964_p5 = scmp.ne.s32.totalorder (!%p963_p0), %s958_s21, 0 }
  0x48   : > { %191 = sbr.rel (%p963_p0) target bundleno = 150 (0x96), region = 28  ;;  %s437_s5 = sshll.u32 (!%p963_p0), %s193_s4, 4 }
  0x49   : > { %s194_s6 = scalar_lea.sflag (!%p963_p0), [#allocation4], %s193_s4  ;;  %s197_s7 = scalar_lea.vmem (!%p963_p0), [#allocation3], %s437_s5 }
  0x4f   : > { %671 = dma.done.wait (%p964_p5), %s194_s6, 256  }
  0x50   : > { %673 = vsyncadd (%p964_p5), %s194_s6, 4294967040  ;;  %s203_s29 = scalar_lea.sflag [#allocation7], %s193_s4  ;;  %s206_s8 = scalar_lea.vmem [#allocation6], %s437_s5 }
  0x51   : > { %675 = dma.done.wait (%p964_p5), %s203_s29, 256  }
  0x52   : > { %677 = vsyncadd (%p964_p5), %s203_s29, 4294967040  ;;  %s229_s18 = sand.u32 1, %s689_s10   ;;  %v719_v0 = vmov 0.0   ;;  %v247_v1 = vld [vmem:[%s197_s7] sm:$0xff]  ;;  %v248_v2 = vld [vmem:[%s197_s7 + $0x8] sm:$0xff]  ;;  %p440_p2 = scmp.ge.s32.totalorder %s705_s14, 0 }
  0x53   : > { %s884_s20 = sshll.u32 %s229_s18, 3  ;;  %245 = vst [vmem:[#allocation2] sm:$0xff] %v719_v0  ;;  %246 = vst [vmem:[#allocation2 + $0x8] sm:$0xff] %v719_v0  ;;  %v249_v3 = vld [vmem:[%s206_s8] sm:$0xff]  ;;  %v250_v4 = vld [vmem:[%s206_s8 + $0x8] sm:$0xff] }
  0x54   : > { %v251_v5 = vsub.f32 %v247_v1, %v249_v3  ;;  %v252_v6 = vsub.f32 %v248_v2, %v250_v4  ;;  %s231_s21 = scalar_lea.vmem [#allocation8], %s884_s20 }
  0x56   : > { %v253_v7 = vmul.f32 %v251_v5, %v251_v5  ;;  %v254_v8 = vmul.f32 %v252_v6, %v252_v6 }
  0x58   : > { %v255_v9 = vadd.f32 1e-12, %v253_v7  ;;  %v256_v10 = vadd.f32 1e-12, %v254_v8 }
  0x5a   : > { %542 = vrsqrt.f32 %v255_v9  ;;  %vm259_vm0 = vcmp.eq.f32.partialorder %v255_v9, inf  ;;  %v262_v12 = vand.u32 2147483648, %v255_v9  ;;  %vm261_vm1 = vcmp.eq.f32.partialorder %v255_v9, 0.0  ;;  %v275_v21 = vld [vmem:[#allocation2] sm:$0xff] (!%p440_p2)  ;;  %v276_v22 = vld [vmem:[#allocation2 + $0x8] sm:$0xff] (!%p440_p2) }
  0x5b   : > { %544 = vrsqrt.f32 %v256_v10  ;;  %vm266_vm2 = vcmp.eq.f32.partialorder %v256_v10, inf  ;;  %v269_v15 = vand.u32 2147483648, %v256_v10  ;;  %vm268_vm3 = vcmp.eq.f32.partialorder %v256_v10, 0.0 }
  0x63   : > { %274 = sbr.rel (%p440_p2) target bundleno = 109 (0x6d), region = 44 }
  0x64   : > { %v543_v11 = vpop.eup %542 }
  0x65   : > { %v545_v13 = vpop.eup %544  ;;  %v258_v14 = vmul.f32 %v543_v11, %v255_v9 }
  0x66   : > { %v265_v16 = vmul.f32 %v545_v13, %v256_v10 }
  0x67   : > { %v260_v17 = vsel %vm259_vm0, %v255_v9, %v258_v14 }
  0x68   : > { %v263_v18 = vsel %vm261_vm1, %v262_v12, %v260_v17  ;;  %v267_v19 = vsel %vm266_vm2, %v256_v10, %v265_v16 }
  0x69   : > { %v270_v20 = vsel %vm268_vm3, %v269_v15, %v267_v19  ;;  %v277_v23 = vadd.f32 (!%p440_p2), %v275_v21, %v263_v18 }
  0x6a   : > { %v278_v24 = vadd.f32 %v276_v22, %v270_v20 }
  0x6b   : > { %279 = vst [vmem:[#allocation2] sm:$0xff] %v277_v23 }
  0x6c   : > { %280 = vst [vmem:[#allocation2 + $0x8] sm:$0xff] %v278_v24 }
  0x6d PF: > { %p441_p8 = scmp.ne.s32.totalorder %s705_s14, 0 }
  0x6e   : > { %v285_v25 = vlaneseq (!%p441_p8) }
  0x6f   : > { %284 = sbr.rel (%p441_p8) target bundleno = 125 (0x7d), region = 48 }
  0x70   : > { %v286_v26 = vshrl.u32 (!%p441_p8), %v285_v25, 7  ;;  %v289_v27 = vand.u32 (!%p441_p8), 127, %v285_v25 }
  0x72   : > { %v290_v28 = vmul.u32 (!%p441_p8), 128, %v286_v26  ;;  %v287_v29 = vadd.s32 (!%p441_p8), 8, %v286_v26  ;;  %v296_v32 = vld [vmem:[#allocation2] sm:$0xff] (!%p441_p8) }
  0x73   : > { %v297_v35 = vld [vmem:[#allocation2 + $0x8] sm:$0xff] (!%p441_p8) }
  0x74   : > { %v292_v30 = vadd.s32 (!%p441_p8), %v290_v28, %v289_v27  ;;  %v291_v31 = vmul.u32 (!%p441_p8), 128, %v287_v29 }
  0x76   : > { %vm294_vm4 = vcmp.lt.s32.totalorder %v292_v30, 2048  ;;  %v293_v33 = vadd.s32 %v291_v31, %v289_v27 }
  0x77   : > { %v298_v34 = vsel %vm294_vm4, %v263_v18, 0.0 }
  0x78   : > { %v300_v36 = vadd.f32 %v298_v34, %v296_v32  ;;  %vm295_vm5 = vcmp.lt.s32.totalorder %v293_v33, 2048 }
  0x79   : > { %v299_v37 = vsel %vm295_vm5, %v270_v20, 0.0 }
  0x7a   : > { %302 = vst [vmem:[#allocation2] sm:$0xff] %v300_v36  ;;  %v301_v38 = vadd.f32 %v299_v37, %v297_v35 }
  0x7c   : > { %303 = vst [vmem:[#allocation2 + $0x8] sm:$0xff] %v301_v38 }
  0x7d PF: > { %s443_s27 = sshll.u32 %s705_s14, 7  ;;  %s325_s17 = sshll.u32 %s231_s21, 4  ;;  %s897_s17 = int_to_ptr.vmem [resolvable:$true] %s325_s17 }
  0x7e   : > { %s893_s12 = scalar_lea.hbm %s954_s2, %s443_s27  ;;  %s312_s22 = scalar_lea.sflag [#allocation5], %s229_s18 }
  0x7f   : > { %s606_s23 = scalar_lea.vmem %s897_s17, 128  ;;  %p965_p10 = scmp.ne.s32.totalorder %s959_s25, 0 }
  0x80   : > { %p607_p9 = scmp.ne.s32.totalorder %s897_s17, %s606_s23  ;;  %s720_s14 = smov [#allocation8]  }
  0x81   : > { %v307_v39 = vld [vmem:[#allocation2] sm:$0xff]  ;;  %s610_s30 = sshll.u32 %s720_s14, 4  ;;  %s611_s30 = int_to_ptr.vmem [resolvable:$false] %s610_s30 }
  0x82   : > { %p608_p11 = pnand %p607_p9, %p965_p10  ;;  %s612_s4 = scalar_lea.vmem %s611_s30, 256 }
  0x83   : > { %v308_v40 = vld [vmem:[#allocation2 + $0x8] sm:$0xff]  ;;  %p613_p3 = scmp.lt.s32.totalorder %s897_s17, %s611_s30  ;;  %p614_p7 = scmp.lt.s32.totalorder %s612_s4, %s606_s23 }
  0x84   : > { %v309_v41 = vadd.f32 %v308_v40, %v307_v39  ;;  %p609_p1 = pneg %p608_p11 }
  0x85   : > { %p615_p13 = por %p614_p7, %p613_p3 }
  0x86   : > { %310 = vst [vmem:[%s231_s21] sm:$0xff] %v309_v41 }
  0x87   : > { %p616_p4 = pnand %p615_p13, %p609_p1 }
  0x89   : > { %619 = shalt.err (!%p616_p4)
}
  0x8a   : > { %s620_s5 = scalar_lea.hbm %s893_s12, 128  ;;  %s624_s29 = scalar_lea.hbm %s954_s2, 256 }
  0x8b   : > { %p621_p6 = scmp.ne.s32.totalorder %s893_s12, %s620_s5  ;;  %p625_p5 = scmp.lt.u32.totalorder %s893_s12, %s954_s2 }
  0x8c   : > { %p626_p2 = scmp.lt.u32.totalorder %s624_s29, %s620_s5  ;;  %p628_p9 = scmp.lt.u32.totalorder %s620_s5, %s893_s12 }
  0x8d   : > { %p622_p12 = pnand %p621_p6, %p965_p10 }
  0x8e   : > { %p627_p8 = por %p626_p2, %p625_p5 }
  0x8f   : > { %p623_p0 = pneg %p622_p12 }
  0x90   : > { %p629_p11 = por %p628_p9, %p627_p8 }
  0x92   : > { %p630_p1 = pnand %p629_p11, %p623_p0 }
  0x94   : > { %633 = shalt.err (!%p630_p1)
}
  0x95   : > { %452 = dma.vmem_to_hbm [thread:$0]  (%p965_p10), %s897_s17, 128, %s893_s12, %s312_s22  }
  0x96 PF: > { %s337_s20 = sand.u32 1, %s685_s9   ;;  %p966_p3 = scmp.ne.s32.totalorder %s960_s26, 0 }
  0x97   : > { %p967_p7 = scmp.ge.s32.totalorder %s713_s16, 2  ;;  %s338_s21 = scalar_lea.sflag [#allocation5], %s337_s20 }
  0x99   : > { %p462_p13 = pnand %p967_p7, %p966_p3 }
  0x9b   : > { %679 = dma.done.wait (!%p462_p13), %s338_s21, 128  }
  0x9c   : > { %681 = vsyncadd (!%p462_p13), %s338_s21, 4294967168  ;;  %s21_s16 = sadd.s32 1, %s713_s16   ;;  %s968_s9 = smov %s689_s10 }
  0x9d   : > { %p18_p4 = scmp.ge.s32.totalorder %s21_s16, 4   ;;  %s969_s10 = smov %s693_s11 }
  0x9e   : > { %s970_s11 = smov %s794_s24  ;;  %s971_s12 = smov %s701_s13 }
  0x9f   : > { %s942_s13 = smov 0   ;;  %s972_s14 = smov %s709_s15 }
  0xa0   : > { %s973_s15 = smov %s975_s19  ;;  %20 = sbr.rel (!%p18_p4) target bundleno = 9 (0x9), region = 102 }
  0xa7   :  { %343 = vsyncpa [#allocation4], 1 }
  0xa8   :  { %345 = vsyncpa [#allocation4 + $0x1], 1 }
  0xa9   :  { %346 = vsyncpa [#allocation7], 1 }
  0xaa   :  { %348 = vsyncpa [#allocation7 + $0x1], 1 }
  0xab   :  { %349 = vsyncpa [#allocation5], 1 }
  0xac   :  { %351 = vsyncpa [#allocation5 + $0x1], 1 }

</bundles_post_ra>
